<compile_context>
chip_gen: v5e
topology: v5e:2x2
jax: 0.10.0
libtpu: 0.0.40
codegen_flags: <defaults>
</compile_context>

<pallas_src>
import functools

import jax
import jax.numpy as jnp
from jax.experimental import pallas as pl
from jax.experimental.pallas import tpu as pltpu

ALPHA = 0.25
GAMMA = 2.0

_LANES = 128
_MAX_BLOCK_ROWS = 2048   # 2048 * 128 * 4 B = 1 MiB per input block
_NUM_SPLITS = 2          # leading "parallel" axis -> both v7x TensorCores


def _focal_loss_kernel(pred_ref, tgt_ref, out_ref, acc_ref, *,
                       blocks_per_split, block_rows, n_full_rows, n_rem,
                       alpha, gamma):
    k = pl.program_id(1)

    @pl.when(k == 0)
    def _():
        acc_ref[...] = jnp.zeros_like(acc_ref)

    # Unclamped global block id (the index_map clamps the DMA; masking here
    # uses the unclamped id so overshoot steps contribute exactly zero).
    blk = pl.program_id(0) * blocks_per_split + k

    p = pred_ref[...].astype(jnp.float32)
    is_pos = tgt_ref[...].astype(jnp.float32) > 0.5

    p_t = jnp.where(is_pos, p, 1.0 - p)
    p_t = jnp.clip(p_t, 1e-8, 1.0 - 1e-8)
    log_p = jnp.log(p_t)                            # single EUP op / element
    a_t = jnp.where(is_pos, alpha, 1.0 - alpha)
    one_m = 1.0 - p_t
    if gamma == 2.0:                                # static: pow -> VPU multiply
        focal = one_m * one_m
    else:
        focal = jnp.power(one_m, gamma)
    loss = -(a_t * focal * log_p)

    # Validity mask: lane padding, partial tail blocks and fully-out-of-range
    # (clamped) tail steps all become exact zeros (where drops any garbage).
    row_iota = jax.lax.broadcasted_iota(jnp.int32, loss.shape, 0)
    lane_iota = jax.lax.broadcasted_iota(jnp.int32, loss.shape, 1)
    row_idx = blk * block_rows + row_iota
    valid = (row_idx < n_full_rows) | (
        (row_idx == n_full_rows) & (lane_iota < n_rem))
    loss = jnp.where(valid, loss, 0.0)

    # Fold (block_rows, 128) -> (8, 128) per-lane partials: the reshape splits
    # the sublane dim on native (8, 128) tile boundaries (no data movement)
    # and the reduce over the leading axis is pure VPU adds (no XLU per step).
    acc_ref[...] += jnp.sum(
        loss.reshape(block_rows // 8, 8, loss.shape[-1]), axis=0)

    @pl.when(k == blocks_per_split - 1)
    def _():
        out_ref[...] = acc_ref[...]


@functools.partial(jax.jit, static_argnames=("size_average",))
def focal_loss(pred, target, size_average=True):
    """pred: probabilities of class 1 (any shape); target: 0/1 (same shape)."""
    p = pred.reshape(-1)        # no dtype cast here: cast happens in-kernel
    t = target.reshape(-1)
    n = p.shape[0]

    # Pad only to the next lane multiple (<= 127 elems, and only when needed);
    # tiny inputs are padded to at least 8 rows so the block never exceeds the
    # array.  Padded / out-of-range elements are masked inside the kernel.
    n_pad = max(pl.cdiv(n, _LANES) * _LANES, 8 * _LANES)
    if n_pad != n:
        p = jnp.pad(p, (0, n_pad - n))
        t = jnp.pad(t, (0, n_pad - n))

    rows = n_pad // _LANES
    p2 = p.reshape(rows, _LANES)
    t2 = t.reshape(rows, _LANES)

    block_rows = min(_MAX_BLOCK_ROWS, (rows // 8) * 8)   # multiple of 8, <= rows
    n_blocks = pl.cdiv(rows, block_rows)
    blocks_per_split = pl.cdiv(n_blocks, _NUM_SPLITS)

    def in_map(s, k):
        # Clamp so overshoot steps of a split never request a block that lies
        # entirely past the array; their contribution is masked to zero.
        return (jnp.minimum(s * blocks_per_split + k, n_blocks - 1), 0)

    kernel = functools.partial(
        _focal_loss_kernel,
        blocks_per_split=blocks_per_split,
        block_rows=block_rows,
        n_full_rows=n // _LANES,
        n_rem=n % _LANES,
        alpha=ALPHA,
        gamma=GAMMA,
    )

    partials = pl.pallas_call(
        kernel,
        out_shape=jax.ShapeDtypeStruct((_NUM_SPLITS * 8, _LANES), jnp.float32),
        grid_spec=pltpu.PrefetchScalarGridSpec(
            num_scalar_prefetch=0,
            grid=(_NUM_SPLITS, blocks_per_split),
            in_specs=[
                pl.BlockSpec((block_rows, _LANES), in_map),
                pl.BlockSpec((block_rows, _LANES), in_map),
            ],
            out_specs=pl.BlockSpec((8, _LANES), lambda s, k: (s, 0)),
            scratch_shapes=[pltpu.VMEM((8, _LANES), jnp.float32)],
        ),
        compiler_params=pltpu.CompilerParams(
            dimension_semantics=("parallel", "arbitrary")),
    )(p2, t2)

    total = jnp.sum(partials)      # single tiny cross-lane reduce, in JAX
    if size_average:
        return total / jnp.float32(n)
    return total


def _ref_focal_loss(pred, target, size_average=True):
    pf = pred.reshape(-1).astype(jnp.float32)
    tf = target.reshape(-1).astype(jnp.float32)
    p_t = jnp.clip(jnp.where(tf > 0.5, pf, 1.0 - pf), 1e-8, 1.0 - 1e-8)
    a_t = jnp.where(tf > 0.5, ALPHA, 1.0 - ALPHA)
    loss = -a_t * jnp.square(1.0 - p_t) * jnp.log(p_t)
    return jnp.mean(loss) if size_average else jnp.sum(loss)


if __name__ == "__main__":
    key = jax.random.PRNGKey(0)

    # 1) canonical small NCHW input (aligned, single block per split)
    k1, k2, key = jax.random.split(key, 3)
    pred = jax.random.uniform(k1, (2, 4, 16, 16), dtype=jnp.float32)
    target = jax.random.bernoulli(k2, 0.3, (2, 4, 16, 16)).astype(jnp.int32)
    out = focal_loss(pred, target)
    jax.block_until_ready(out)
    assert jnp.allclose(out, _ref_focal_loss(pred, target), rtol=1e-5,
                        atol=1e-6), (out, _ref_focal_loss(pred, target))

    # 2) odd, non-lane-aligned shape (exercises pad + partial tail block)
    k1, k2, key = jax.random.split(key, 3)
    pred2 = jax.random.uniform(k1, (3, 5, 33, 17), dtype=jnp.float32)
    target2 = jax.random.bernoulli(k2, 0.4, (3, 5, 33, 17)).astype(jnp.int32)
    out2 = focal_loss(pred2, target2, size_average=False)
    jax.block_until_ready(out2)
    ref2 = _ref_focal_loss(pred2, target2, size_average=False)
    assert jnp.allclose(out2, ref2, rtol=1e-4, atol=1e-5), (out2, ref2)

    # 3) multi-block input (exercises multiple grid steps per split + clamp)
    k1, k2, key = jax.random.split(key, 3)
    pred3 = jax.random.uniform(k1, (2, 4, 256, 384), dtype=jnp.float32)
    target3 = jax.random.bernoulli(k2, 0.3, (2, 4, 256, 384)).astype(jnp.int32)
    out3 = focal_loss(pred3, target3)
    jax.block_until_ready(out3)
    ref3 = _ref_focal_loss(pred3, target3)
    assert jnp.allclose(out3, ref3, rtol=1e-4, atol=1e-6), (out3, ref3)

    print("KERNEL_OK")
</pallas_src>

<mosaic_0001>
module attributes {stable_mosaic.version = 11 : i64} {
  func.func @_focal_loss_kernel(%arg0: i32, %arg1: i32, %arg2: memref<16x128xf32, #tpu.memory_space<vmem>>, %arg3: memref<16x128xi32, #tpu.memory_space<vmem>>, %arg4: memref<8x128xf32, #tpu.memory_space<vmem>>, %arg5: memref<8x128xf32, #tpu.memory_space<vmem>>) attributes {dimension_semantics = [#tpu.dimension_semantics<parallel>, #tpu.dimension_semantics<arbitrary>], iteration_bounds = array<i64: 2, 1>, scalar_prefetch = 0 : i64, scratch_operands = 1 : i64, tpu.core_type = #tpu.core_type<tc>, window_params = [{transform_indices = @transform_0, window_bounds = array<i64: 16, 128>}, {transform_indices = @transform_1, window_bounds = array<i64: 16, 128>}, {transform_indices = @transform_2, window_bounds = array<i64: 8, 128>}]} {
    %c0_i32 = arith.constant 0 : i32
    %0 = arith.cmpi eq, %arg1, %c0_i32 : i32
    %1 = arith.extui %0 : i1 to i32
    %c0_i32_0 = arith.constant 0 : i32
    %2 = arith.cmpi ne, %1, %c0_i32_0 : i32
    scf.if %2 {
      %cst_22 = arith.constant 0.000000e+00 : f32
      %51 = vector.broadcast %cst_22 : f32 to vector<8x128xf32>
      %c0_23 = arith.constant 0 : index
      %c0_24 = arith.constant 0 : index
      %52 = vector.load %arg5[%c0_23, %c0_24] : memref<8x128xf32, #tpu.memory_space<vmem>>, vector<8x128xf32>
      tpu.vector_store %arg5[%c0_23, %c0_24], %51 {strides = array<i32>} : memref<8x128xf32, #tpu.memory_space<vmem>>, vector<8x128xf32>,
    } else {
    }
    %c1_i32 = arith.constant 1 : i32
    %3 = arith.muli %arg0, %c1_i32 : i32
    %4 = arith.addi %3, %arg1 : i32
    %c0 = arith.constant 0 : index
    %c0_1 = arith.constant 0 : index
    %5 = vector.load %arg2[%c0, %c0_1] : memref<16x128xf32, #tpu.memory_space<vmem>>, vector<16x128xf32>
    %c0_2 = arith.constant 0 : index
    %c0_3 = arith.constant 0 : index
    %6 = vector.load %arg3[%c0_2, %c0_3] : memref<16x128xi32, #tpu.memory_space<vmem>>, vector<16x128xi32>
    %7 = arith.sitofp %6 : vector<16x128xi32> to vector<16x128xf32>
    %cst = arith.constant 5.000000e-01 : f32
    %8 = vector.broadcast %cst : f32 to vector<16x128xf32>
    %9 = arith.cmpf ogt, %7, %8 : vector<16x128xf32>
    %cst_4 = arith.constant 1.000000e+00 : f32
    %10 = vector.broadcast %cst_4 : f32 to vector<16x128xf32>
    %11 = arith.subf %10, %5 : vector<16x128xf32>
    %12 = arith.select %9, %5, %11 : vector<16x128xi1>, vector<16x128xf32>
    %cst_5 = arith.constant 9.99999993E-9 : f32
    %cst_6 = arith.constant 1.000000e+00 : f32
    %13 = vector.broadcast %cst_5 : f32 to vector<16x128xf32>
    %14 = arith.maximumf %13, %12 : vector<16x128xf32>
    %15 = vector.broadcast %cst_6 : f32 to vector<16x128xf32>
    %16 = arith.minimumf %15, %14 : vector<16x128xf32>
    %17 = math.log %16 : vector<16x128xf32>
    %cst_7 = arith.constant 2.500000e-01 : f32
    %cst_8 = arith.constant 7.500000e-01 : f32
    %18 = vector.broadcast %cst_7 : f32 to vector<16x128xf32>
    %19 = vector.broadcast %cst_8 : f32 to vector<16x128xf32>
    %20 = arith.select %9, %18, %19 : vector<16x128xi1>, vector<16x128xf32>
    %cst_9 = arith.constant 1.000000e+00 : f32
    %21 = vector.broadcast %cst_9 : f32 to vector<16x128xf32>
    %22 = arith.subf %21, %16 : vector<16x128xf32>
    %23 = arith.mulf %22, %22 : vector<16x128xf32>
    %24 = arith.mulf %20, %23 : vector<16x128xf32>
    %25 = arith.mulf %24, %17 : vector<16x128xf32>
    %cst_10 = arith.constant 0.000000e+00 : f32
    %26 = vector.broadcast %cst_10 : f32 to vector<16x128xf32>
    %27 = arith.subf %26, %25 : vector<16x128xf32>
    %28 = tpu.iota {dimensions = array<i32: 0>} : vector<16x128xi32>
    %29 = tpu.iota {dimensions = array<i32: 1>} : vector<16x128xi32>
    %c16_i32 = arith.constant 16 : i32
    %30 = arith.muli %4, %c16_i32 : i32
    %31 = vector.broadcast %30 : i32 to vector<16x128xi32>
    %32 = arith.addi %31, %28 : vector<16x128xi32>
    %c16_i32_11 = arith.constant 16 : i32
    %33 = vector.broadcast %c16_i32_11 : i32 to vector<16x128xi32>
    %34 = arith.cmpi slt, %32, %33 : vector<16x128xi32>
    %c16_i32_12 = arith.constant 16 : i32
    %35 = vector.broadcast %c16_i32_12 : i32 to vector<16x128xi32>
    %36 = arith.cmpi eq, %32, %35 : vector<16x128xi32>
    %c0_i32_13 = arith.constant 0 : i32
    %37 = vector.broadcast %c0_i32_13 : i32 to vector<16x128xi32>
    %38 = arith.cmpi slt, %29, %37 : vector<16x128xi32>
    %39 = arith.andi %36, %38 : vector<16x128xi1>
    %40 = arith.ori %34, %39 : vector<16x128xi1>
    %cst_14 = arith.constant 0.000000e+00 : f32
    %41 = vector.broadcast %cst_14 : f32 to vector<16x128xf32>
    %42 = arith.select %40, %27, %41 : vector<16x128xi1>, vector<16x128xf32>
    %c0_15 = arith.constant 0 : index
    %c0_16 = arith.constant 0 : index
    %43 = vector.load %arg5[%c0_15, %c0_16] : memref<8x128xf32, #tpu.memory_space<vmem>>, vector<8x128xf32>
    %44 = vector.shape_cast %42 : vector<16x128xf32> to vector<2x8x128xf32>
    %cst_17 = arith.constant dense<0.000000e+00> : vector<8x128xf32>
    %45 = vector.multi_reduction <add>, %44, %cst_17 [0] : vector<2x8x128xf32> to vector<8x128xf32>
    %46 = arith.addf %43, %45 : vector<8x128xf32>
    %c0_18 = arith.constant 0 : index
    %c0_19 = arith.constant 0 : index
    %47 = vector.load %arg5[%c0_18, %c0_19] : memref<8x128xf32, #tpu.memory_space<vmem>>, vector<8x128xf32>
    tpu.vector_store %arg5[%c0_18, %c0_19], %46 {strides = array<i32>} : memref<8x128xf32, #tpu.memory_space<vmem>>, vector<8x128xf32>,
    %c0_i32_20 = arith.constant 0 : i32
    %48 = arith.cmpi eq, %arg1, %c0_i32_20 : i32
    %49 = arith.extui %48 : i1 to i32
    %c0_i32_21 = arith.constant 0 : i32
    %50 = arith.cmpi ne, %49, %c0_i32_21 : i32
    scf.if %50 {
      %c0_22 = arith.constant 0 : index
      %c0_23 = arith.constant 0 : index
      %51 = vector.load %arg5[%c0_22, %c0_23] : memref<8x128xf32, #tpu.memory_space<vmem>>, vector<8x128xf32>
      %c0_24 = arith.constant 0 : index
      %c0_25 = arith.constant 0 : index
      %52 = vector.load %arg4[%c0_24, %c0_25] : memref<8x128xf32, #tpu.memory_space<vmem>>, vector<8x128xf32>
      tpu.vector_store %arg4[%c0_24, %c0_25], %51 {strides = array<i32>} : memref<8x128xf32, #tpu.memory_space<vmem>>, vector<8x128xf32>,
    } else {
    }
    return
  }
  func.func @transform_0(%arg0: i32, %arg1: i32) -> (i32, i32) {
    %c1_i32 = arith.constant 1 : i32
    %0 = arith.muli %arg0, %c1_i32 : i32
    %1 = arith.addi %0, %arg1 : i32
    %c0_i32 = arith.constant 0 : i32
    %2 = arith.minsi %1, %c0_i32 : i32
    %c0_i32_0 = arith.constant 0 : i32
    %c0_i32_1 = arith.constant 0 : i32
    return %2, %c0_i32_0 : i32, i32
  }
  func.func @transform_1(%arg0: i32, %arg1: i32) -> (i32, i32) {
    %c1_i32 = arith.constant 1 : i32
    %0 = arith.muli %arg0, %c1_i32 : i32
    %1 = arith.addi %0, %arg1 : i32
    %c0_i32 = arith.constant 0 : i32
    %2 = arith.minsi %1, %c0_i32 : i32
    %c0_i32_0 = arith.constant 0 : i32
    %c0_i32_1 = arith.constant 0 : i32
    return %2, %c0_i32_0 : i32, i32
  }
  func.func @transform_2(%arg0: i32, %arg1: i32) -> (i32, i32) {
    %c0_i32 = arith.constant 0 : i32
    %c0_i32_0 = arith.constant 0 : i32
    return %arg0, %c0_i32 : i32, i32
  }
}

</mosaic_0001>

<bundles_post_ra>
// kernel: focal_loss.1
= control target key start
LH: loop header
LB: loop body
LE: loop exit
PB: predicated region body
PF: predicated region fallthrough
CT: control target
= control target key end

     0   :  { %s442_s9 = smov 0   ;;  %s444_s10 = smov 0   ;;  %s501_s0 = inlined_call_operand.vmem [shape: f32[16,128], index: 0, kind: input, shape index: {}]   ;;  %s502_s1 = inlined_call_operand.vmem [shape: s32[16,128], index: 1, kind: input, shape index: {}]   ;;  %s503_s2 = inlined_call_operand.vmem [shape: f32[16,128], index: 2, kind: output, shape index: {}]  }
   0x1   :  { %s446_s11 = smov 0  }
   0x2 LB: > { %s24_s12 = sadd.s32 1, %s420_s10  ;;  %p364_p0 = scmp.ge.s32.totalorder %s424_s11, 1  ;;  %s424_s11 = sphi %s446_s11, %s12_s11   ;;  %s420_s10 = sphi %s444_s10, %s509_s10   ;;  %s416_s9 = sphi %s442_s9, %s508_s9  }
   0x3   : > { %p26_p1 = scmp.ge.s32.totalorder %s24_s12, 2  ;;  %p160_p2 = scmp.lt.s32.totalorder %s424_s11, 3 }
   0x5   : > { %s511_s12 = smov (%p26_p1, %s24_s12), 0  ;;  %p161_p3 = pnand %p364_p0, %p160_p2 }
   0x6   : > { %p193_p4 = scmp.lt.s32.totalorder (!%p161_p3), %s416_s9, 0  ;;  %s370_s22 = sshll.u32 (!%p161_p3), %s416_s9, 4 }
   0x7   : > { %164 = sbr.rel (%p161_p3) target bundleno = 48 (0x30), region = 28  ;;  %p216_p6 = scmp.lt.s32.totalorder (!%p161_p3), %s416_s9, 1 }
   0xc   : > { %s194_s13 = scalar_select %p193_p4, %s416_s9, 0  ;;  %v258_v11 = vlaneseq  ;;  %v426_v20 = vmov 0.75   ;;  %v264_v26 = vstv %s370_s22 }
   0xd   : > { %s515_s9 = smov (!%p216_p6, %s416_s9), 1 }
   0xe   : > { %s365_s14 = sshll.u32 %s194_s13, 1  ;;  %v259_v17 = vshrl.u32 %v258_v11, 7  ;;  %s369_s23 = sshll.u32 %s515_s9, 3 }
   0xf   : > { %p196_p5 = scmp.lt.s32.totalorder %s365_s14, 1  ;;  %s219_s26 = scalar_lea.vmem %s503_s2, %s369_s23 }
  0x10   : > { %v260_v25 = vadd.s32 8, %v259_v17  ;;  %v265_v30 = vadd.s32 %v264_v26, %v259_v17 }
  0x11   : > { %s513_s14 = smov (!%p196_p5, %s365_s14), 1 }
  0x12   : > { %s366_s15 = sshll.u32 %s513_s14, 3  ;;  %v266_v33 = vadd.s32 %v264_v26, %v260_v25  ;;  %vm267_vm2 = vcmp.lt.s32.totalorder %v265_v30, 16 }
  0x13   : > { %s199_s18 = scalar_lea.vmem %s501_s0, %s366_s15  ;;  %s211_s21 = scalar_lea.vmem %s502_s1, %s366_s15 }
  0x14   : > { %v226_v0 = vld [vmem:[%s199_s18] sm:$0xff]  ;;  %v227_v1 = vld [vmem:[%s199_s18 + $0x8] sm:$0xff]  ;;  %vm268_vm3 = vcmp.lt.s32.totalorder %v266_v33, 16 }
  0x15   : > { %v228_v2 = vld [vmem:[%s211_s21] sm:$0xff]  ;;  %v229_v3 = vld [vmem:[%s211_s21 + $0x8] sm:$0xff]  ;;  %v234_v5 = vsub.f32 1.0, %v226_v0  ;;  %v235_v6 = vsub.f32 1.0, %v227_v1 }
  0x16   : > { %v230_v4 = vcvt.s32.f32 %v228_v2  ;;  %v231_v7 = vcvt.s32.f32 %v229_v3 }
  0x18   : > { %vm470_vm0 = vcmp.gt.f32.partialorder %v230_v4, 0.5  ;;  %vm474_vm1 = vcmp.gt.f32.partialorder %v231_v7, 0.5 }
  0x19   : > { %v236_v10 = vsel %vm470_vm0, %v226_v0, %v234_v5  ;;  %v237_v12 = vsel %vm474_vm1, %v227_v1, %v235_v6  ;;  %v246_v21 = vsel %vm470_vm0, 0.25, %v426_v20  ;;  %v247_v23 = vsel %vm474_vm1, 0.25, %v426_v20 }
  0x1a   : > { %v238_v13 = vmax.f32 %v236_v10, 1e-08  ;;  %v239_v14 = vmax.f32 %v237_v12, 1e-08 }
  0x1c   : > { %v240_v15 = vmin.f32 %v238_v13, 1.0  ;;  %v241_v16 = vmin.f32 %v239_v14, 1.0 }
  0x1e   : > { %398 = vlog2.f32 %v240_v15  ;;  %v248_v18 = vsub.f32 1.0, %v240_v15  ;;  %v249_v19 = vsub.f32 1.0, %v241_v16 }
  0x1f   : > { %400 = vlog2.f32 %v241_v16 }
  0x20   : > { %v250_v22 = vmul.f32 %v248_v18, %v248_v18  ;;  %v251_v24 = vmul.f32 %v249_v19, %v249_v19 }
  0x22   : > { %v252_v27 = vmul.f32 %v250_v22, %v246_v21  ;;  %v253_v29 = vmul.f32 %v251_v24, %v247_v23 }
  0x24   : > { %v399_v28 = vpop.eup %398 }
  0x25   : > { %v401_v31 = vpop.eup %400  ;;  %v243_v32 = vmul.f32 0.6931472, %v399_v28 }
  0x26   : > { %v245_v34 = vmul.f32 0.6931472, %v401_v31 }
  0x27   : > { %v254_v35 = vmul.f32 %v252_v27, %v243_v32 }
  0x28   : > { %v255_v36 = vmul.f32 %v253_v29, %v245_v34 }
  0x29   : > { %v256_v37 = vsub.f32 0.0, %v254_v35 }
  0x2a   : > { %v257_v38 = vsub.f32 0.0, %v255_v36 }
  0x2b   : > { %v276_v39 = vsel %vm267_vm2, %v256_v37, 0.0 }
  0x2c   : > { %v277_v40 = vsel %vm268_vm3, %v257_v38, 0.0 }
  0x2d   : > { %v279_v41 = vadd.f32 %v277_v40, %v276_v39 }
  0x2f   : > { %286 = vst [vmem:[%s219_s26] sm:$0xff] %v279_v41 }
  0x30 PF: > { %s12_s11 = sadd.s32 1, %s424_s11   ;;  %s508_s9 = smov %s420_s10 }
  0x31   : > { %p9_p7 = scmp.ge.s32.totalorder %s12_s11, 4   ;;  %s509_s10 = smov %s511_s12 }
  0x33   :  { %11 = sbr.rel (!%p9_p7) target bundleno = 2 (0x2), region = 69 }

</bundles_post_ra>
